<compile_context>
chip_gen: v5e
topology: v5e:2x2
jax: 0.10.0
libtpu: 0.0.40
codegen_flags: <defaults>
</compile_context>

<pallas_src>
import functools

import jax
import jax.numpy as jnp
from jax.experimental import pallas as pl
from jax.experimental.pallas import tpu as pltpu


# ---------------------------------------------------------------------------
# Kernels
# ---------------------------------------------------------------------------
def _ca_kernel(x_ref, w1t_ref, b1_ref, w2t_ref, b2_ref, o_ref):
    """Single-pass: full (Nb, C, L) sample block resident in VMEM."""
    l = x_ref.shape[-1]
    x = x_ref[...]                                               # native dtype

    # AdaptiveAvgPool1d(1): f32-accumulated sum over L (no f32 block copy).
    pooled = jnp.sum(x, axis=-1, dtype=jnp.float32) * (1.0 / l)  # (Nb, C)

    # 1x1 conv C->Cr (+bias), ReLU; 1x1 conv Cr->C (+bias), Sigmoid.
    h = jnp.dot(pooled, w1t_ref[...],
                preferred_element_type=jnp.float32) + b1_ref[...]
    h = jnp.maximum(h, 0.0)
    s = jnp.dot(h, w2t_ref[...],
                preferred_element_type=jnp.float32) + b2_ref[...]
    gate = jax.nn.sigmoid(s).astype(x.dtype)                     # (Nb, C)

    # Channel-wise rescale in the I/O dtype; single full-tile store.
    o_ref[...] = (x * gate[:, :, None]).astype(o_ref.dtype)


def _pool_gate_kernel(x_ref, w1t_ref, b1_ref, w2t_ref, b2_ref, g_ref, acc_ref,
                      *, inv_l):
    """L-tiled pool + gate. Grid = (N blocks, L tiles); L axis is a reduction."""
    li = pl.program_id(1)

    @pl.when(li == 0)
    def _():
        acc_ref[...] = jnp.zeros_like(acc_ref)

    acc_ref[...] += jnp.sum(x_ref[...], axis=-1, dtype=jnp.float32)

    @pl.when(li == pl.num_programs(1) - 1)
    def _():
        pooled = acc_ref[...] * inv_l                            # (Nb, C)
        h = jnp.dot(pooled, w1t_ref[...],
                    preferred_element_type=jnp.float32) + b1_ref[...]
        h = jnp.maximum(h, 0.0)
        s = jnp.dot(h, w2t_ref[...],
                    preferred_element_type=jnp.float32) + b2_ref[...]
        g_ref[...] = jax.nn.sigmoid(s)[:, :, None]               # (Nb, C, 1)


def _scale_kernel(g_ref, x_ref, o_ref):
    """L-tiled rescale: out = x * gate, gate broadcast over L."""
    x = x_ref[...]
    o_ref[...] = (x * g_ref[...].astype(x.dtype)).astype(o_ref.dtype)


# ---------------------------------------------------------------------------
# Sizing helpers
# ---------------------------------------------------------------------------
def _tpu_vmem_bytes():
    try:
        info = pltpu.get_tpu_info()
        return int(getattr(info, "vmem_capacity_bytes", 64 << 20))
    except Exception:
        return 64 << 20          # conservative (v7x-sized) fallback


def _choose_nb(n, per_sample_bytes, max_block_bytes, min_grid):
    """Largest batch block Nb that divides N, fits the byte cap, and (when
    possible) leaves at least `min_grid` grid steps."""
    best = 1
    for nb in range(1, n + 1):
        if n % nb:
            continue
        if nb * per_sample_bytes > max_block_bytes:
            break
        if nb > 1 and n // nb < min_grid:
            break
        best = nb
    return best


def _choose_tl(l, c, itemsize, max_block_bytes):
    """Largest L tile that is a multiple of 128, divides L, fits the cap, and
    leaves >= 2 tiles. Returns None if no such tile exists."""
    best = None
    tl = 128
    while tl < l:
        if l % tl == 0:
            if c * tl * itemsize > max_block_bytes:
                break
            best = tl
        tl += 128
    return best


# ---------------------------------------------------------------------------
# Wrapper
# ---------------------------------------------------------------------------
def ca_layer(x, w1, b1, w2, b2, *, nb=None, max_block_bytes=None):
    """Channel attention. x: (N, C, L); w1: (Cr, C); b1: (Cr,); w2: (C, Cr); b2: (C,)."""
    N, C, L = x.shape
    Cr = w1.shape[0]
    itemsize = jnp.dtype(x.dtype).itemsize

    # Per-generation sizing: v5e/v6e have 128 MiB VMEM; v7x has 64 MiB and two
    # TensorCores (want >= 2 grid steps per core so the pipeline can overlap).
    vmem_bytes = _tpu_vmem_bytes()
    small_vmem = vmem_bytes < (100 << 20)
    if max_block_bytes is None:
        max_block_bytes = (4 << 20) if small_vmem else (8 << 20)
    min_grid = 4 if small_vmem else 2

    # Lane-dense weight orientation, prepared once on the host (f32).
    w1t = jnp.asarray(w1).T.astype(jnp.float32)          # (C, Cr)
    w2t = jnp.asarray(w2).T.astype(jnp.float32)          # (Cr, C)
    b1r = jnp.asarray(b1).reshape(1, Cr).astype(jnp.float32)
    b2r = jnp.asarray(b2).reshape(1, C).astype(jnp.float32)
    weight_bytes = int(w1t.size + w2t.size + b1r.size + b2r.size) * 4

    # Constant-index full-array blocks: weights stay resident, no per-step DMA.
    weight_specs = [
        pl.BlockSpec((C, Cr), lambda *_: (0, 0)),
        pl.BlockSpec((1, Cr), lambda *_: (0, 0)),
        pl.BlockSpec((Cr, C), lambda *_: (0, 0)),
        pl.BlockSpec((1, C), lambda *_: (0, 0)),
    ]

    per_sample = C * L * itemsize
    use_tiled = (nb is None) and (per_sample > max_block_bytes)
    tl = _choose_tl(L, C, itemsize, max_block_bytes) if use_tiled else None
    if use_tiled and tl is None:
        use_tiled = False
        # TODO(synk): ragged L (no 128-multiple divisor) falls back to a single
        # oversized block; a masked L-tiled reduction would bound VMEM here too.

    if not use_tiled:
        # ----- Path A: whole-sample block fits VMEM -> single fused pass -----
        if nb is None:
            nb = _choose_nb(N, per_sample, max_block_bytes, min_grid)
        assert N % nb == 0, "batch must be divisible by the chosen block size"

        block_bytes = nb * per_sample
        f32_tmp = nb * C * L * 4 if itemsize < 4 else 0   # reduce temp (bf16 I/O)
        vmem_limit = 4 * block_bytes + f32_tmp + 2 * weight_bytes + (2 << 20)
        vmem_limit = max(16 << 20, min(int(vmem_limit), int(vmem_bytes * 0.85)))

        return pl.pallas_call(
            _ca_kernel,
            out_shape=jax.ShapeDtypeStruct((N, C, L), x.dtype),
            grid_spec=pltpu.PrefetchScalarGridSpec(
                num_scalar_prefetch=0,
                grid=(N // nb,),
                in_specs=[pl.BlockSpec((nb, C, L), lambda n: (n, 0, 0))]
                         + weight_specs,
                out_specs=pl.BlockSpec((nb, C, L), lambda n: (n, 0, 0)),
            ),
            compiler_params=pltpu.CompilerParams(
                dimension_semantics=("parallel",),
                vmem_limit_bytes=vmem_limit,
            ),
        )(x, w1t, b1r, w2t, b2r)

    # ----- Path B: one sample exceeds the cap -> two-phase L-tiled pipeline ---
    nb_t = 1
    grid = (N // nb_t, L // tl)
    tile_bytes = nb_t * C * tl * itemsize
    f32_tmp = nb_t * C * tl * 4 if itemsize < 4 else 0
    gate_bytes = N * C * 4

    # Phase 1: L-tiled pooling + squeeze-excite -> gate (N, C, 1) in f32.
    pool_vmem = 2 * tile_bytes + f32_tmp + 2 * weight_bytes + gate_bytes + (4 << 20)
    pool_vmem = max(16 << 20, min(int(pool_vmem), int(vmem_bytes * 0.85)))
    gate = pl.pallas_call(
        functools.partial(_pool_gate_kernel, inv_l=1.0 / L),
        out_shape=jax.ShapeDtypeStruct((N, C, 1), jnp.float32),
        grid_spec=pltpu.PrefetchScalarGridSpec(
            num_scalar_prefetch=0,
            grid=grid,
            in_specs=[pl.BlockSpec((nb_t, C, tl), lambda n, li: (n, 0, li))]
                     + weight_specs,
            out_specs=pl.BlockSpec((nb_t, C, 1), lambda n, li: (n, 0, 0)),
            scratch_shapes=[pltpu.VMEM((nb_t, C), jnp.float32)],
        ),
        compiler_params=pltpu.CompilerParams(
            dimension_semantics=("parallel", "arbitrary"),
            vmem_limit_bytes=pool_vmem,
        ),
    )(x, w1t, b1r, w2t, b2r)

    # Phase 2: L-tiled channel rescale.
    scale_vmem = 4 * tile_bytes + 2 * gate_bytes + (4 << 20)
    scale_vmem = max(16 << 20, min(int(scale_vmem), int(vmem_bytes * 0.85)))
    return pl.pallas_call(
        _scale_kernel,
        out_shape=jax.ShapeDtypeStruct((N, C, L), x.dtype),
        grid_spec=pltpu.PrefetchScalarGridSpec(
            num_scalar_prefetch=0,
            grid=grid,
            in_specs=[
                pl.BlockSpec((nb_t, C, 1), lambda n, li: (n, 0, 0)),
                pl.BlockSpec((nb_t, C, tl), lambda n, li: (n, 0, li)),
            ],
            out_specs=pl.BlockSpec((nb_t, C, tl), lambda n, li: (n, 0, li)),
        ),
        compiler_params=pltpu.CompilerParams(
            dimension_semantics=("parallel", "parallel"),
            vmem_limit_bytes=scale_vmem,
        ),
    )(gate, x)


# ---------------------------------------------------------------------------
# Host-side helpers + self-test
# ---------------------------------------------------------------------------
def _weight_norm_effective(v):
    # PyTorch weight_norm(dim=0): w = g * v / ||v||, g initialized to ||v||,
    # so the effective weight at init equals v. Computed explicitly (with eps).
    norm = jnp.sqrt(jnp.sum(v * v, axis=tuple(range(1, v.ndim)), keepdims=True))
    g = norm
    return g * v / jnp.maximum(norm, 1e-12)


def _reference(x, w1, b1, w2, b2):
    y = jnp.mean(x, axis=2, keepdims=True)                                  # (N, C, 1)
    h = jnp.maximum(jnp.einsum('oc,ncl->nol', w1, y) + b1[None, :, None], 0.0)
    g = jax.nn.sigmoid(jnp.einsum('oc,ncl->nol', w2, h) + b2[None, :, None])
    return x * g


if __name__ == "__main__":
    key = jax.random.PRNGKey(0)
    reduction = 8

    # ---- single-pass path ----
    N, C, L = 4, 16, 128
    Cr = C // reduction
    kx, k1, kb1, k2, kb2, kx2 = jax.random.split(key, 6)
    x = jax.random.normal(kx, (N, C, L), dtype=jnp.float32)

    # Conv1d weights have shape (out, in, 1); squeeze the 1-wide kernel dim.
    v1 = jax.random.normal(k1, (Cr, C, 1), dtype=jnp.float32) * 0.1
    b1 = jax.random.normal(kb1, (Cr,), dtype=jnp.float32) * 0.1
    v2 = jax.random.normal(k2, (C, Cr, 1), dtype=jnp.float32) * 0.1
    b2 = jax.random.normal(kb2, (C,), dtype=jnp.float32) * 0.1
    w1 = _weight_norm_effective(v1)[:, :, 0]   # (Cr, C)
    w2 = _weight_norm_effective(v2)[:, :, 0]   # (C, Cr)

    out = ca_layer(x, w1, b1, w2, b2)
    jax.block_until_ready(out)
    ref = _reference(x, w1, b1, w2, b2)
    assert jnp.allclose(out, ref, atol=1e-5, rtol=1e-5), "single-pass mismatch"

    # ---- L-tiled path (forced with a tiny block cap to exercise it cheaply) ----
    N2, L2 = 2, 256
    x2 = jax.random.normal(kx2, (N2, C, L2), dtype=jnp.float32)
    out2 = ca_layer(x2, w1, b1, w2, b2,
                    max_block_bytes=C * 128 * x2.dtype.itemsize)
    jax.block_until_ready(out2)
    ref2 = _reference(x2, w1, b1, w2, b2)
    assert jnp.allclose(out2, ref2, atol=1e-5, rtol=1e-5), "tiled-path mismatch"

    print("KERNEL_OK")
</pallas_src>

<mosaic_0001>
module attributes {stable_mosaic.version = 11 : i64} {
  func.func @_ca_kernel(%arg0: i32, %arg1: memref<1x16x128xf32, #tpu.memory_space<vmem>>, %arg2: memref<16x2xf32, #tpu.memory_space<vmem>>, %arg3: memref<1x2xf32, #tpu.memory_space<vmem>>, %arg4: memref<2x16xf32, #tpu.memory_space<vmem>>, %arg5: memref<1x16xf32, #tpu.memory_space<vmem>>, %arg6: memref<1x16x128xf32, #tpu.memory_space<vmem>>) attributes {dimension_semantics = [#tpu.dimension_semantics<parallel>], iteration_bounds = array<i64: 4>, scalar_prefetch = 0 : i64, scratch_operands = 0 : i64, tpu.core_type = #tpu.core_type<tc>, window_params = [{transform_indices = @transform_0, window_bounds = array<i64: 1, 16, 128>}, {pipeline_mode = #tpu.pipeline_mode<synchronous>, transform_indices = @transform_1, window_bounds = array<i64: 16, 2>}, {pipeline_mode = #tpu.pipeline_mode<synchronous>, transform_indices = @transform_2, window_bounds = array<i64: 1, 2>}, {pipeline_mode = #tpu.pipeline_mode<synchronous>, transform_indices = @transform_3, window_bounds = array<i64: 2, 16>}, {pipeline_mode = #tpu.pipeline_mode<synchronous>, transform_indices = @transform_4, window_bounds = array<i64: 1, 16>}, {transform_indices = @transform_5, window_bounds = array<i64: 1, 16, 128>}]} {
    %c0 = arith.constant 0 : index
    %c0_0 = arith.constant 0 : index
    %c0_1 = arith.constant 0 : index
    %0 = vector.load %arg1[%c0, %c0_0, %c0_1] : memref<1x16x128xf32, #tpu.memory_space<vmem>>, vector<1x16x128xf32>
    %cst = arith.constant dense<0.000000e+00> : vector<1x16xf32>
    %1 = vector.multi_reduction <add>, %0, %cst [2] : vector<1x16x128xf32> to vector<1x16xf32>
    %cst_2 = arith.constant 7.812500e-03 : f32
    %2 = vector.broadcast %cst_2 : f32 to vector<1x16xf32>
    %3 = arith.mulf %1, %2 : vector<1x16xf32>
    %c0_3 = arith.constant 0 : index
    %c0_4 = arith.constant 0 : index
    %4 = vector.load %arg2[%c0_3, %c0_4] : memref<16x2xf32, #tpu.memory_space<vmem>>, vector<16x2xf32>
    %cst_5 = arith.constant dense<0.000000e+00> : vector<1x2xf32>
    %5 = tpu.matmul %3, %4, %cst_5 {dimension_numbers = #tpu.dot_dimension_numbers<[1], [0], [0], [1], [0, 0, 1, 1], [], []>} : vector<1x16xf32>, vector<16x2xf32>, vector<1x2xf32> -> vector<1x2xf32>
    %c0_6 = arith.constant 0 : index
    %c0_7 = arith.constant 0 : index
    %6 = vector.load %arg3[%c0_6, %c0_7] : memref<1x2xf32, #tpu.memory_space<vmem>>, vector<1x2xf32>
    %7 = arith.addf %5, %6 : vector<1x2xf32>
    %cst_8 = arith.constant 0.000000e+00 : f32
    %8 = vector.broadcast %cst_8 : f32 to vector<1x2xf32>
    %9 = arith.maximumf %7, %8 : vector<1x2xf32>
    %c0_9 = arith.constant 0 : index
    %c0_10 = arith.constant 0 : index
    %10 = vector.load %arg4[%c0_9, %c0_10] : memref<2x16xf32, #tpu.memory_space<vmem>>, vector<2x16xf32>
    %cst_11 = arith.constant dense<0.000000e+00> : vector<1x16xf32>
    %11 = tpu.matmul %9, %10, %cst_11 {dimension_numbers = #tpu.dot_dimension_numbers<[1], [0], [0], [1], [0, 0, 1, 1], [], []>} : vector<1x2xf32>, vector<2x16xf32>, vector<1x16xf32> -> vector<1x16xf32>
    %c0_12 = arith.constant 0 : index
    %c0_13 = arith.constant 0 : index
    %12 = vector.load %arg5[%c0_12, %c0_13] : memref<1x16xf32, #tpu.memory_space<vmem>>, vector<1x16xf32>
    %13 = arith.addf %11, %12 : vector<1x16xf32>
    %14 = arith.negf %13 : vector<1x16xf32>
    %15 = math.exp %14 : vector<1x16xf32>
    %cst_14 = arith.constant 1.000000e+00 : f32
    %16 = vector.broadcast %cst_14 : f32 to vector<1x16xf32>
    %17 = arith.addf %16, %15 : vector<1x16xf32>
    %18 = arith.divf %16, %17 : vector<1x16xf32>
    %19 = vector.shape_cast %18 : vector<1x16xf32> to vector<1x16x1xf32>
    %20 = vector.broadcast %19 : vector<1x16x1xf32> to vector<1x16x128xf32>
    %21 = arith.mulf %0, %20 : vector<1x16x128xf32>
    %c0_15 = arith.constant 0 : index
    %c0_16 = arith.constant 0 : index
    %c0_17 = arith.constant 0 : index
    %22 = vector.load %arg6[%c0_15, %c0_16, %c0_17] : memref<1x16x128xf32, #tpu.memory_space<vmem>>, vector<1x16x128xf32>
    tpu.vector_store %arg6[%c0_15, %c0_16, %c0_17], %21 {strides = array<i32>} : memref<1x16x128xf32, #tpu.memory_space<vmem>>, vector<1x16x128xf32>,
    return
  }
  func.func @transform_0(%arg0: i32) -> (i32, i32, i32) {
    %c0_i32 = arith.constant 0 : i32
    %c0_i32_0 = arith.constant 0 : i32
    %c0_i32_1 = arith.constant 0 : i32
    return %arg0, %c0_i32, %c0_i32_0 : i32, i32, i32
  }
  func.func @transform_1(%arg0: i32) -> (i32, i32) {
    %c0_i32 = arith.constant 0 : i32
    %c0_i32_0 = arith.constant 0 : i32
    %c0_i32_1 = arith.constant 0 : i32
    return %c0_i32, %c0_i32_0 : i32, i32
  }
  func.func @transform_2(%arg0: i32) -> (i32, i32) {
    %c0_i32 = arith.constant 0 : i32
    %c0_i32_0 = arith.constant 0 : i32
    %c0_i32_1 = arith.constant 0 : i32
    return %c0_i32, %c0_i32_0 : i32, i32
  }
  func.func @transform_3(%arg0: i32) -> (i32, i32) {
    %c0_i32 = arith.constant 0 : i32
    %c0_i32_0 = arith.constant 0 : i32
    %c0_i32_1 = arith.constant 0 : i32
    return %c0_i32, %c0_i32_0 : i32, i32
  }
  func.func @transform_4(%arg0: i32) -> (i32, i32) {
    %c0_i32 = arith.constant 0 : i32
    %c0_i32_0 = arith.constant 0 : i32
    %c0_i32_1 = arith.constant 0 : i32
    return %c0_i32, %c0_i32_0 : i32, i32
  }
  func.func @transform_5(%arg0: i32) -> (i32, i32, i32) {
    %c0_i32 = arith.constant 0 : i32
    %c0_i32_0 = arith.constant 0 : i32
    %c0_i32_1 = arith.constant 0 : i32
    return %arg0, %c0_i32, %c0_i32_0 : i32, i32, i32
  }
}

</mosaic_0001>

<bundles_post_ra>
// kernel: tpu_custom_call.1
= control target key start
LH: loop header
LB: loop body
LE: loop exit
PB: predicated region body
PF: predicated region fallthrough
CT: control target
= control target key end

     0   :  { %10 = vsyncpa [#allocation3], 0  ;;  %s801_s0 = inlined_call_operand.hbm [shape: f32[4,16,128], index: 0, kind: input, shape index: {}]   ;;  %s802_s1 = inlined_call_operand.vmem [shape: f32[16,2], index: 1, kind: input, shape index: {}]   ;;  %s803_s2 = inlined_call_operand.vmem [shape: f32[1,2], index: 2, kind: input, shape index: {}]   ;;  %s804_s3 = inlined_call_operand.vmem [shape: f32[2,16], index: 3, kind: input, shape index: {}]   ;;  %s805_s4 = inlined_call_operand.vmem [shape: f32[1,16], index: 4, kind: input, shape index: {}]   ;;  %s806_s5 = inlined_call_operand.hbm [shape: f32[4,16,128], index: 5, kind: output, shape index: {}]  }
   0x1   :  { %12 = vsyncpa [#allocation3 + $0x1], 0 }
   0x2   :  { %13 = vsyncpa [#allocation4], 0 }
   0x3   :  { %15 = vsyncpa [#allocation4 + $0x1], 0  ;;  %s653_s18 = smov 0   ;;  %s655_s19 = smov 0  }
   0x4   :  { %s657_s20 = smov 0   ;;  %s659_s21 = smov 0  }
   0x5 LB: > { %s674_s22 = sadd.s32 4294967295, %s617_s21   ;;  %s444_s23 = sadd.s32 4294967294, %s617_s21   ;;  %s617_s21 = sphi %s659_s21, %s815_s21   ;;  %s613_s20 = sphi %s657_s20, %s814_s20   ;;  %s609_s19 = sphi %s655_s19, %s813_s19   ;;  %s605_s18 = sphi %s653_s18, %s812_s18  }
   0x6   : > { %s678_s24 = sadd.s32 1, %s617_s21   ;;  %s28_s25 = sadd.s32 1, %s613_s20 }
   0x7   : > { %s25_s26 = ssub.s32 %s617_s21, %s678_s24  ;;  %p35_p0 = scmp.ne.s32.totalorder %s613_s20, %s609_s19 }
   0x8   : > { %p26_p1 = scmp.eq.s32.totalorder %s25_s26, 0  ;;  %p36_p2 = scmp.eq.s32.totalorder %s617_s21, 0 }
   0x9   : > { %p41_p3 = scmp.ne.s32.totalorder %s609_s19, %s605_s18  ;;  %p42_p4 = scmp.eq.s32.totalorder %s674_s22, 0 }
   0xa   : > { %s690_s27 = scalar_select %p26_p1, %s613_s20, %s28_s25  }
   0xb   : > { %p692_p5 = por %p36_p2, %p35_p0  ;;  %p696_p6 = por %p42_p4, %p41_p3 }
   0xc   : > { %p149_p7 = scmp.eq.s32.totalorder %s674_s22, 3  ;;  %p155_p8 = scmp.eq.s32.totalorder %s444_s23, 3 }
   0xd   : > { %p476_p9 = scmp.lt.s32.totalorder %s617_s21, 4  ;;  %s187_s7 = sand.u32 1, %s613_s20  }
   0xe   : > { %p702_p10 = por %p149_p7, %p35_p0  ;;  %p706_p11 = por %p155_p8, %p41_p3 }
   0xf   : > { %s462_s8 = sshll.u32 %s617_s21, 4  ;;  %s447_s9 = sshll.u32 %s187_s7, 4 }
  0x10   : > { %s196_s12 = scalar_lea.hbm %s801_s0, %s462_s8  ;;  %s191_s14 = scalar_lea.vmem [#allocation2], %s447_s9 }
  0x11   : > { %s197_s13 = sshll.u32 %s196_s12, 4  ;;  %s199_s15 = sshll.u32 %s191_s14, 4  ;;  %s198_s13 = int_to_ptr.hbm [resolvable:$true] %s197_s13  ;;  %s200_s15 = int_to_ptr.vmem [resolvable:$true] %s199_s15 }
  0x12   : > { %p717_p12 = pnand %p476_p9, %p692_p5  ;;  %p450_p13 = scmp.ge.s32.totalorder %s617_s21, 1 }
  0x13   : > { %p207_p0 = scmp.lt.s32.totalorder %s617_s21, 5  ;;  %s188_s17 = scalar_lea.sflag [#allocation3], %s187_s7 }
  0x14   : > { %s521_s23 = sshra.s32 %s198_s13, 4  ;;  %p525_p2 = pneg %p717_p12  ;;  %s522_s23 = int_to_ptr.hbm [resolvable:$true] %s521_s23 }
  0x15   : > { %s523_s25 = scalar_lea.hbm %s522_s23, 16  ;;  %s528_s28 = scalar_lea.hbm %s801_s0, 64 }
  0x16   : > { %p524_p1 = scmp.ne.s32.totalorder %s522_s23, %s523_s25  ;;  %p529_p5 = scmp.lt.s32.totalorder %s522_s23, %s801_s0 }
  0x17   : > { %p530_p7 = scmp.lt.s32.totalorder %s528_s28, %s523_s25 }
  0x18   : > { %p526_p3 = pnand %p525_p2, %p524_p1 }
  0x19   : > { %p531_p8 = por %p530_p7, %p529_p5 }
  0x1a   : > { %p527_p4 = pneg %p526_p3 }
  0x1c   : > { %p532_p9 = pnand %p531_p8, %p527_p4 }
  0x1e   : > { %535 = shalt.err (!%p532_p9)
}
  0x1f   : > { %s619_s7 = smov 128   ;;  %s620_s11 = smov 8  }
  0x20   : > { %471 = dma.hbm_to_vmem [thread:$0]  (!%p717_p12), %s198_s13, 256, %s200_s15, %s188_s17, %s619_s7, %s619_s7, %s620_s11  }
  0x21   : > { %p208_p1 = pnand %p450_p13, %p207_p0 }
  0x22   : > { %s738_s12 = sand.u32 (!%p208_p1), 1, %s609_s19  }
  0x23   : > { %211 = sbr.rel (%p208_p1) target bundleno = 596 (0x254), region = 40  ;;  %s451_s14 = sshll.u32 (!%p208_p1), %s738_s12, 4 }
  0x24   : > { %s214_s23 = scalar_lea.sflag (!%p208_p1), [#allocation3], %s738_s12  ;;  %s217_s25 = scalar_lea.vmem (!%p208_p1), [#allocation2], %s451_s14 }
  0x28   : > { %596 = dma.done.wait (%p696_p6), %s214_s23, 256  }
  0x29   : > { %598 = vsyncadd (%p696_p6), %s214_s23, 4294967040  ;;  %v245_v0 = vld [vmem:[%s217_s25] sm:$0xff]  ;;  %v748_v1 = vld [vmem:[%s217_s25 + $0x8] sm:$0xff]  ;;  %v258_v5 = vlaneseq  ;;  %vm263_vm0 = vcmask 130112   ;;  %vm265_vm1 = vcmask 130048   ;;  %vm295_vm2 = vcmask 1041408  }
  0x2a   : > { %247 = vadd.xlane.f32.xlu0 %v245_v0  ;;  %v254_v2 = vld [vmem:[%s802_s1 + $0x8] sm:$0xff]  ;;  %v253_v3 = vld [vmem:[%s802_s1] sm:$0xff]  ;;  %vm291_vm3 = vcmask 15360   ;;  %s244_s7 = scalar_lea.vmem [#allocation5], %s451_s14  ;;  %s463_s11 = sshll.u32 %s674_s22, 4 }
  0x2b   : > { %282 = vmatpush.msra.mxu0 %v254_v2  ;;  %v259_v6 = vand.u32 127, %v258_v5  ;;  %v289_v14 = vld [vmem:[%s804_s3] sm:$0x3]  ;;  %v340_v19 = vshrl.u32 %v258_v5, 7  ;;  %s367_s13 = scalar_lea.hbm %s806_s5, %s463_s11  ;;  %s368_s15 = sshll.u32 %s244_s7, 4  ;;  %s369_s15 = int_to_ptr.vmem [resolvable:$true] %s368_s15 }
  0x2c   : > { %454 = vmatpush.msk.msra.mxu1 %vm295_vm2, %v289_v14  ;;  %v255_v15 = vld [vmem:[%s803_s2] sm:$0x1]  ;;  %s370_s16 = sshll.u32 %s367_s13, 4  ;;  %s356_s17 = scalar_lea.sflag [#allocation4], %s738_s12  ;;  %s371_s16 = int_to_ptr.hbm [resolvable:$true] %s370_s16 }
  0x2d   : > { %283 = vmatpush.msra.mxu0 %v253_v3  ;;  %v261_v8 = vadd.s32 4294967288, %v259_v6  ;;  %514 = vset.pattern.permute.xlu1 %v340_v19  ;;  %v347_v20 = vadd.s32 8, %v340_v19  ;;  %v290_v21 = vld [vmem:[%s805_s4] sm:$0x1]  ;;  %s565_s29 = sshra.s32 %s371_s16, 4  ;;  %s571_s8 = scalar_lea.hbm %s806_s5, 64  ;;  %s566_s29 = int_to_ptr.hbm [resolvable:$true] %s565_s29 }
  0x2e   : > { %s567_s26 = scalar_lea.hbm %s566_s29, 16  ;;  %p572_p0 = scmp.lt.s32.totalorder %s566_s29, %s806_s5 }
  0x2f   : > { %516 = vset.pattern.permute.xlu0 %v347_v20  ;;  %p568_p6 = scmp.ne.s32.totalorder %s566_s29, %s567_s26  ;;  %p573_p2 = scmp.lt.s32.totalorder %s571_s8, %s567_s26 }
  0x31   : > { %p569_p12 = pnand %p568_p6, %p702_p10  ;;  %p574_p3 = por %p573_p2, %p572_p0 }
  0x32   : > { %249 = vadd.xlane.f32.xlu0 %v748_v1 }
  0x33   : > { %p570_p13 = pneg %p569_p12 }
  0x35   : > { %p575_p4 = pnand %p574_p3, %p570_p13 }
  0x9d   : > { %v248_v4 = vpop.xlane.xlu0 %247 }
  0x9e   : > { %v251_v7 = vmul.f32 0.0078125, %v248_v4 }
  0xa0   : > { %v260_v11 = vperm.slane %v251_v7, %v259_v6 }
  0xa5   : > { %v250_v9 = vpop.xlane.xlu0 %249 }
  0xa6   : > { %v252_v10 = vmul.f32 0.0078125, %v250_v9 }
  0xa8   : > { %v262_v12 = vperm.slane %v252_v10, %v261_v8 }
  0xaa   : > { %v264_v13 = vsel %vm263_vm0, %v262_v12, %v260_v11 }
  0xab   : > { %453 = vmatmul.msk.f32.vlgmr.msra.gmra.mxu0 %vm265_vm1, %v264_v13 }
 0x128   : > { %v285_v16 = vpop.f32.mrf.mxu0 }
 0x129   : > { %v286_v17 = vadd.f32 %v285_v16, %v255_v15 }
 0x12b   : > { %v288_v18 = vmax.f32 %v286_v17, 0.0 }
 0x12d   : > { %455 = vmatmul.msk.f32.vlgmr.msra.gmra.mxu1 %vm291_vm3, %v288_v18 }
 0x1aa   : > { %v316_v22 = vpop.f32.mrf.mxu1 }
 0x1ab   : > { %v317_v23 = vadd.f32 %v316_v22, %v290_v21 }
 0x1ad   : > { %v456_v24 = vmul.f32 -1.442695, %v317_v23 }
 0x1af   : > { %517 = vpow2.f32 %v456_v24 }
 0x1b5   : > { %v518_v25 = vpop.eup %517 }
 0x1b6   : > { %v322_v26 = vadd.f32 1.0, %v518_v25 }
 0x1b8   : > { %519 = vrcp.f32 %v322_v26  ;;  %v334_v30 = vand.u32 2147483648, %v322_v26  ;;  %v332_v32 = vand.u32 2147483647, %v322_v26  ;;  %vm328_vm5 = vweird.f32 %v322_v26 }
 0x1ba   : > { %v335_v34 = vor.u32 1.1754944e-38, %v334_v30  ;;  %vm333_vm7 = vcmp.eq.f32.partialorder %v332_v32, 8.507059e+37 }
 0x1be   : > { %v520_v27 = vpop.eup %519 }
 0x1bf   : > { %v324_v28 = vmul.f32 %v520_v27, %v322_v26  ;;  %vm329_vm4 = vweird.f32 %v520_v27 }
 0x1c0   : > { %vm330_vm6 = vmor %vm328_vm5, %vm329_vm4 }
 0x1c1   : > { %v325_v29 = vsub.f32 1.0, %v324_v28 }
 0x1c3   : > { %v326_v31 = vmul.f32 %v520_v27, %v325_v29 }
 0x1c5   : > { %v327_v33 = vadd.f32 %v520_v27, %v326_v31 }
 0x1c7   : > { %v331_v35 = vsel %vm330_vm6, %v520_v27, %v327_v33 }
 0x1c8   : > { %v336_v36 = vsel %vm333_vm7, %v335_v34, %v331_v35 }
 0x1c9   : > { %v338_v37 = vperm.slane %v336_v36, 0 }
 0x1cb   : > { %343 = vperm.xlu1 %514, %v338_v37  }
 0x1d3   : > { %515 = vset.pattern.permute.xlu1 %v347_v20 }
 0x1db   : > { %349 = vperm.xlu1 %515, %v338_v37  }
 0x23d   : > { %v344_v38 = vpop.permute.xlu1 %343 }
 0x23e   : > { %v351_v39 = vmul.f32 %v344_v38, %v245_v0 }
 0x240   : > { %353 = vst [vmem:[%s244_s7] sm:$0xff] %v351_v39 }
 0x24d   : > { %v350_v40 = vpop.permute.xlu1 %349 }
 0x24e   : > { %v352_v41 = vmul.f32 %v350_v40, %v748_v1 }
 0x250   : > { %354 = vst [vmem:[%s244_s7 + $0x8] sm:$0xff] %v352_v41 }
 0x251   : > { %578 = shalt.err (!%p575_p4)
}
 0x252   : > { %s621_s12 = smov 128   ;;  %s622_s10 = smov 8  }
 0x253   : > { %466 = dma.vmem_to_hbm [thread:$0]  (%p702_p10), %s369_s15, 256, %s371_s16, %s356_s17, %s621_s12, %s621_s12, %s622_s10  }
 0x254 PF: > { %p477_p5 = scmp.ge.s32.totalorder %s617_s21, 2  ;;  %s385_s7 = sand.u32 1, %s605_s18  }
 0x255   : > { %s386_s11 = scalar_lea.sflag [#allocation4], %s385_s7 }
 0x256   : > { %p473_p7 = pnand %p477_p5, %p706_p11 }
 0x258   : > { %p474_p8 = pneg %p473_p7 }
 0x25a   : > { %600 = dma.done.wait (%p474_p8), %s386_s11, 256  }
 0x25b   : > { %602 = vsyncadd (%p474_p8), %s386_s11, 4294967040  ;;  %p18_p9 = scmp.ge.s32.totalorder %s678_s24, 6   ;;  %s812_s18 = smov %s609_s19 }
 0x25c   : > { %s813_s19 = smov %s613_s20  ;;  %s814_s20 = smov %s690_s27 }
 0x25d   : > { %s815_s21 = smov %s678_s24  ;;  %20 = sbr.rel (!%p18_p9) target bundleno = 5 (0x5), region = 85 }
 0x262   :  { %392 = vsyncpa [#allocation3], 1 }
 0x263   :  { %394 = vsyncpa [#allocation3 + $0x1], 1 }
 0x264   :  { %395 = vsyncpa [#allocation4], 1 }
 0x265   :  { %397 = vsyncpa [#allocation4 + $0x1], 1 }

</bundles_post_ra>
